<compile_context>
chip_gen: v6e
topology: v6e:2x2x1
jax: 0.10.0
libtpu: 0.0.40
codegen_flags: <defaults>
</compile_context>

<pallas_src>
import functools

import jax
import jax.numpy as jnp
from jax.experimental import pallas as pl
from jax.experimental.pallas import tpu as pltpu


def _mha_kernel(q_ref, k_ref, v_ref,
                wq_ref, wk_ref, wv_ref, wfc_ref,
                gamma_ref, beta_ref,
                out_ref, attn_ref,
                acc_ref,
                *, n_head, d_k, d_v, eps):
    h = pl.program_id(1)

    # Activations for this batch element; bf16 copies feed the MXU,
    # the f32 original is kept for the residual path.
    q_bf = q_ref[0].astype(jnp.bfloat16)     # (L_q, D)
    k_bf = k_ref[0].astype(jnp.bfloat16)     # (L_k, D)
    v_bf = v_ref[0].astype(jnp.bfloat16)     # (L_v, D)

    @pl.when(h == 0)
    def _():
        # Start the output-projection accumulator with the residual (q).
        acc_ref[...] = q_ref[0].astype(jnp.float32)

    # Per-head projections: bf16 MXU, f32 accumulation.
    qh = jnp.dot(q_bf, wq_ref[0], preferred_element_type=jnp.float32)   # (L_q, d_k)
    kh = jnp.dot(k_bf, wk_ref[0], preferred_element_type=jnp.float32)   # (L_k, d_k)
    vh = jnp.dot(v_bf, wv_ref[0], preferred_element_type=jnp.float32)   # (L_v, d_v)

    inv_scale = 1.0 / (d_k ** 0.5)
    qh = (qh * inv_scale).astype(jnp.bfloat16)   # fold 1/sqrt(d_k) into Q once
    kh = kh.astype(jnp.bfloat16)
    vh = vh.astype(jnp.bfloat16)

    # scores[q, k] = sum_d qh[q, d] * kh[k, d]   (no explicit transpose of K).
    scores = jax.lax.dot_general(
        qh, kh,
        dimension_numbers=(((1,), (1,)), ((), ())),
        preferred_element_type=jnp.float32)      # (L_q, L_k), f32

    # Numerically-stable softmax, f32 on the VPU; divide -> EUP approx reciprocal.
    m = jnp.max(scores, axis=-1, keepdims=True)
    e = jnp.exp(scores - m)
    denom = jnp.sum(e, axis=-1, keepdims=True)
    attn = e * pl.reciprocal(denom, approx=True)  # (L_q, L_k)

    attn_ref[0, 0] = attn.astype(attn_ref.dtype)

    # Context for this head and its contribution to the output projection.
    ctx = jnp.dot(attn.astype(jnp.bfloat16), vh,
                  preferred_element_type=jnp.float32)               # (L_q, d_v)
    acc_ref[...] += jnp.dot(ctx.astype(jnp.bfloat16), wfc_ref[0],
                            preferred_element_type=jnp.float32)     # (L_q, D)

    # Last head: LayerNorm(residual + sum_h ctx_h @ Wfc_h) -> output.
    @pl.when(h == n_head - 1)
    def _():
        x = acc_ref[...]                                            # f32
        mu = jnp.mean(x, axis=-1, keepdims=True)
        var = jnp.mean((x - mu) ** 2, axis=-1, keepdims=True)
        normed = (x - mu) * jax.lax.rsqrt(var + eps)
        out = normed * gamma_ref[...] + beta_ref[...]
        out_ref[0] = out.astype(out_ref.dtype)


def multi_head_attention(q, k, v, params, *, n_head, d_k, d_v, eps=1e-6):
    """q, k, v: [B, L, model_d]  (len_k == len_v required)."""
    B, L_q, D = q.shape
    _, L_k, _ = k.shape
    _, L_v, _ = v.shape
    assert L_k == L_v

    wq, wk, wv, wfc, gamma, beta = params

    # Host-side per-head weight split + bf16 cast (halves weight DMA bytes;
    # all MXU dots run bf16 x bf16 with f32 accumulation inside the kernel).
    wq_h = wq.reshape(D, n_head, d_k).transpose(1, 0, 2).astype(jnp.bfloat16)  # (H, D, d_k)
    wk_h = wk.reshape(D, n_head, d_k).transpose(1, 0, 2).astype(jnp.bfloat16)  # (H, D, d_k)
    wv_h = wv.reshape(D, n_head, d_v).transpose(1, 0, 2).astype(jnp.bfloat16)  # (H, D, d_v)
    wfc_h = wfc.reshape(n_head, d_v, D).astype(jnp.bfloat16)                   # (H, d_v, D)
    gamma2 = gamma.reshape(1, D).astype(jnp.float32)
    beta2 = beta.reshape(1, D).astype(jnp.float32)

    kernel = functools.partial(_mha_kernel, n_head=n_head, d_k=d_k, d_v=d_v, eps=eps)

    out_shapes = (
        jax.ShapeDtypeStruct((B, L_q, D), q.dtype),
        jax.ShapeDtypeStruct((B, n_head, L_q, L_k), jnp.float32),
    )

    grid_spec = pltpu.PrefetchScalarGridSpec(
        num_scalar_prefetch=0,
        grid=(B, n_head),
        in_specs=[
            # Activation blocks are constant across the head axis -> fetched once per b.
            pl.BlockSpec((1, L_q, D), lambda b, h: (b, 0, 0)),
            pl.BlockSpec((1, L_k, D), lambda b, h: (b, 0, 0)),
            pl.BlockSpec((1, L_v, D), lambda b, h: (b, 0, 0)),
            # Per-head weight slices selected by the h grid index (no in-kernel slicing).
            pl.BlockSpec((1, D, d_k), lambda b, h: (h, 0, 0)),
            pl.BlockSpec((1, D, d_k), lambda b, h: (h, 0, 0)),
            pl.BlockSpec((1, D, d_v), lambda b, h: (h, 0, 0)),
            pl.BlockSpec((1, d_v, D), lambda b, h: (h, 0, 0)),
            pl.BlockSpec((1, D), lambda b, h: (0, 0)),
            pl.BlockSpec((1, D), lambda b, h: (0, 0)),
        ],
        out_specs=[
            # Output block is constant across h (accumulator); written on the last head.
            pl.BlockSpec((1, L_q, D), lambda b, h: (b, 0, 0)),
            # Attention weights tiled per (batch, head) -> small resident VMEM block.
            pl.BlockSpec((1, 1, L_q, L_k), lambda b, h: (b, h, 0, 0)),
        ],
        scratch_shapes=[pltpu.VMEM((L_q, D), jnp.float32)],   # residual + proj accumulator
    )

    return pl.pallas_call(
        kernel,
        out_shape=out_shapes,
        grid_spec=grid_spec,
        compiler_params=pltpu.CompilerParams(
            dimension_semantics=("parallel", "arbitrary"),
            vmem_limit_bytes=32 * 1024 * 1024),
    )(q, k, v, wq_h, wk_h, wv_h, wfc_h, gamma2, beta2)


def _reference(q, k, v, params, *, n_head, d_k, d_v, eps=1e-6):
    """Plain-JAX f32 reference mirroring the PyTorch forward (dropout = identity)."""
    wq, wk, wv, wfc, gamma, beta = params
    B, L_q, D = q.shape
    L_k = k.shape[1]
    residual = q
    Q = (q @ wq).reshape(B, L_q, n_head, d_k).transpose(0, 2, 1, 3)
    K = (k @ wk).reshape(B, L_k, n_head, d_k).transpose(0, 2, 1, 3)
    V = (v @ wv).reshape(B, L_k, n_head, d_v).transpose(0, 2, 1, 3)
    scores = jnp.einsum("bhqd,bhkd->bhqk", Q, K) / (d_k ** 0.5)
    attn = jax.nn.softmax(scores, axis=-1)
    ctx = jnp.einsum("bhqk,bhkd->bhqd", attn, V)
    ctx = ctx.transpose(0, 2, 1, 3).reshape(B, L_q, n_head * d_v)
    out = ctx @ wfc + residual
    mu = out.mean(-1, keepdims=True)
    var = ((out - mu) ** 2).mean(-1, keepdims=True)
    out = (out - mu) * jax.lax.rsqrt(var + eps) * gamma + beta
    return out, attn


if __name__ == "__main__":
    # Small shapes consistent with the module.
    B, L, model_d = 2, 8, 32
    n_head, d_k, d_v = 4, 8, 8

    key = jax.random.PRNGKey(0)
    kq, kk, kv, kwq, kwk, kwv, kwfc = jax.random.split(key, 7)

    q = jax.random.normal(kq, (B, L, model_d), dtype=jnp.float32)
    k = jax.random.normal(kk, (B, L, model_d), dtype=jnp.float32)
    v = jax.random.normal(kv, (B, L, model_d), dtype=jnp.float32)

    # Weights stored as [in, out] so that x @ W matches nn.Linear(bias=False).
    wq = jax.random.normal(kwq, (model_d, n_head * d_k), jnp.float32) * 0.05
    wk = jax.random.normal(kwk, (model_d, n_head * d_k), jnp.float32) * 0.05
    wv = jax.random.normal(kwv, (model_d, n_head * d_v), jnp.float32) * 0.05
    wfc = jax.random.normal(kwfc, (n_head * d_v, model_d), jnp.float32) * 0.05
    gamma = jnp.ones((model_d,), jnp.float32)
    beta = jnp.zeros((model_d,), jnp.float32)
    params = (wq, wk, wv, wfc, gamma, beta)

    out, attn = multi_head_attention(q, k, v, params, n_head=n_head, d_k=d_k, d_v=d_v)
    out = jax.block_until_ready(out)
    attn = jax.block_until_ready(attn)

    # Sanity check against the f32 plain-JAX reference (kernel uses bf16 MXU inputs
    # and an approximate reciprocal, so compare with a correspondingly loose tolerance).
    ref_out, ref_attn = _reference(q, k, v, params, n_head=n_head, d_k=d_k, d_v=d_v)
    assert jnp.allclose(out, ref_out, atol=3e-2, rtol=3e-2), "output mismatch"
    assert jnp.allclose(attn, ref_attn, atol=1e-2, rtol=1e-2), "attn mismatch"

    print("KERNEL_OK")
</pallas_src>

<mosaic_0001>
module attributes {stable_mosaic.version = 11 : i64} {
  func.func @_mha_kernel(%arg0: i32, %arg1: i32, %arg2: memref<1x8x32xf32, #tpu.memory_space<vmem>>, %arg3: memref<1x8x32xf32, #tpu.memory_space<vmem>>, %arg4: memref<1x8x32xf32, #tpu.memory_space<vmem>>, %arg5: memref<1x32x8xbf16, #tpu.memory_space<vmem>>, %arg6: memref<1x32x8xbf16, #tpu.memory_space<vmem>>, %arg7: memref<1x32x8xbf16, #tpu.memory_space<vmem>>, %arg8: memref<1x8x32xbf16, #tpu.memory_space<vmem>>, %arg9: memref<1x32xf32, #tpu.memory_space<vmem>>, %arg10: memref<1x32xf32, #tpu.memory_space<vmem>>, %arg11: memref<1x8x32xf32, #tpu.memory_space<vmem>>, %arg12: memref<1x1x8x8xf32, #tpu.memory_space<vmem>>, %arg13: memref<8x32xf32, #tpu.memory_space<vmem>>) attributes {dimension_semantics = [#tpu.dimension_semantics<parallel>, #tpu.dimension_semantics<arbitrary>], iteration_bounds = array<i64: 2, 4>, scalar_prefetch = 0 : i64, scratch_operands = 1 : i64, tpu.core_type = #tpu.core_type<tc>, window_params = [{transform_indices = @transform_0, window_bounds = array<i64: 1, 8, 32>}, {transform_indices = @transform_1, window_bounds = array<i64: 1, 8, 32>}, {transform_indices = @transform_2, window_bounds = array<i64: 1, 8, 32>}, {transform_indices = @transform_3, window_bounds = array<i64: 1, 32, 8>}, {transform_indices = @transform_4, window_bounds = array<i64: 1, 32, 8>}, {transform_indices = @transform_5, window_bounds = array<i64: 1, 32, 8>}, {transform_indices = @transform_6, window_bounds = array<i64: 1, 8, 32>}, {pipeline_mode = #tpu.pipeline_mode<synchronous>, transform_indices = @transform_7, window_bounds = array<i64: 1, 32>}, {pipeline_mode = #tpu.pipeline_mode<synchronous>, transform_indices = @transform_8, window_bounds = array<i64: 1, 32>}, {transform_indices = @transform_9, window_bounds = array<i64: 1, 8, 32>}, {transform_indices = @transform_10, window_bounds = array<i64: 1, 1, 8, 8>}]} {
    %c0 = arith.constant 0 : index
    %c0_0 = arith.constant 0 : index
    %c0_1 = arith.constant 0 : index
    %0 = vector.load %arg2[%c0, %c0_0, %c0_1] : memref<1x8x32xf32, #tpu.memory_space<vmem>>, vector<1x8x32xf32>
    %1 = vector.shape_cast %0 : vector<1x8x32xf32> to vector<8x32xf32>
    %2 = arith.truncf %1 : vector<8x32xf32> to vector<8x32xbf16>
    %c0_2 = arith.constant 0 : index
    %c0_3 = arith.constant 0 : index
    %c0_4 = arith.constant 0 : index
    %3 = vector.load %arg3[%c0_2, %c0_3, %c0_4] : memref<1x8x32xf32, #tpu.memory_space<vmem>>, vector<1x8x32xf32>
    %4 = vector.shape_cast %3 : vector<1x8x32xf32> to vector<8x32xf32>
    %5 = arith.truncf %4 : vector<8x32xf32> to vector<8x32xbf16>
    %c0_5 = arith.constant 0 : index
    %c0_6 = arith.constant 0 : index
    %c0_7 = arith.constant 0 : index
    %6 = vector.load %arg4[%c0_5, %c0_6, %c0_7] : memref<1x8x32xf32, #tpu.memory_space<vmem>>, vector<1x8x32xf32>
    %7 = vector.shape_cast %6 : vector<1x8x32xf32> to vector<8x32xf32>
    %8 = arith.truncf %7 : vector<8x32xf32> to vector<8x32xbf16>
    %c0_i32 = arith.constant 0 : i32
    %9 = arith.cmpi eq, %arg1, %c0_i32 : i32
    %10 = arith.extui %9 : i1 to i32
    %c0_i32_8 = arith.constant 0 : i32
    %11 = arith.cmpi ne, %10, %c0_i32_8 : i32
    scf.if %11 {
      %c0_38 = arith.constant 0 : index
      %c0_39 = arith.constant 0 : index
      %c0_40 = arith.constant 0 : index
      %52 = vector.load %arg2[%c0_38, %c0_39, %c0_40] : memref<1x8x32xf32, #tpu.memory_space<vmem>>, vector<1x8x32xf32>
      %53 = vector.shape_cast %52 : vector<1x8x32xf32> to vector<8x32xf32>
      %c0_41 = arith.constant 0 : index
      %c0_42 = arith.constant 0 : index
      %54 = vector.load %arg13[%c0_41, %c0_42] : memref<8x32xf32, #tpu.memory_space<vmem>>, vector<8x32xf32>
      tpu.vector_store %arg13[%c0_41, %c0_42], %53 {strides = array<i32>} : memref<8x32xf32, #tpu.memory_space<vmem>>, vector<8x32xf32>,
    } else {
    }
    %c0_9 = arith.constant 0 : index
    %c0_10 = arith.constant 0 : index
    %c0_11 = arith.constant 0 : index
    %12 = vector.load %arg5[%c0_9, %c0_10, %c0_11] : memref<1x32x8xbf16, #tpu.memory_space<vmem>>, vector<1x32x8xbf16>
    %13 = vector.shape_cast %12 : vector<1x32x8xbf16> to vector<32x8xbf16>
    %cst = arith.constant dense<0.000000e+00> : vector<8x8xf32>
    %14 = tpu.matmul %2, %13, %cst {dimension_numbers = #tpu.dot_dimension_numbers<[1], [0], [0], [1], [0, 0, 1, 1], [], []>} : vector<8x32xbf16>, vector<32x8xbf16>, vector<8x8xf32> -> vector<8x8xf32>
    %c0_12 = arith.constant 0 : index
    %c0_13 = arith.constant 0 : index
    %c0_14 = arith.constant 0 : index
    %15 = vector.load %arg6[%c0_12, %c0_13, %c0_14] : memref<1x32x8xbf16, #tpu.memory_space<vmem>>, vector<1x32x8xbf16>
    %16 = vector.shape_cast %15 : vector<1x32x8xbf16> to vector<32x8xbf16>
    %cst_15 = arith.constant dense<0.000000e+00> : vector<8x8xf32>
    %17 = tpu.matmul %5, %16, %cst_15 {dimension_numbers = #tpu.dot_dimension_numbers<[1], [0], [0], [1], [0, 0, 1, 1], [], []>} : vector<8x32xbf16>, vector<32x8xbf16>, vector<8x8xf32> -> vector<8x8xf32>
    %c0_16 = arith.constant 0 : index
    %c0_17 = arith.constant 0 : index
    %c0_18 = arith.constant 0 : index
    %18 = vector.load %arg7[%c0_16, %c0_17, %c0_18] : memref<1x32x8xbf16, #tpu.memory_space<vmem>>, vector<1x32x8xbf16>
    %19 = vector.shape_cast %18 : vector<1x32x8xbf16> to vector<32x8xbf16>
    %cst_19 = arith.constant dense<0.000000e+00> : vector<8x8xf32>
    %20 = tpu.matmul %8, %19, %cst_19 {dimension_numbers = #tpu.dot_dimension_numbers<[1], [0], [0], [1], [0, 0, 1, 1], [], []>} : vector<8x32xbf16>, vector<32x8xbf16>, vector<8x8xf32> -> vector<8x8xf32>
    %cst_20 = arith.constant 0.353553385 : f32
    %21 = vector.broadcast %cst_20 : f32 to vector<8x8xf32>
    %22 = arith.mulf %14, %21 : vector<8x8xf32>
    %23 = arith.truncf %22 : vector<8x8xf32> to vector<8x8xbf16>
    %24 = arith.truncf %17 : vector<8x8xf32> to vector<8x8xbf16>
    %25 = arith.truncf %20 : vector<8x8xf32> to vector<8x8xbf16>
    %cst_21 = arith.constant dense<0.000000e+00> : vector<8x8xf32>
    %26 = tpu.matmul %23, %24, %cst_21 {dimension_numbers = #tpu.dot_dimension_numbers<[1], [1], [0], [0], [0, 0, 1, 0], [], []>} : vector<8x8xbf16>, vector<8x8xbf16>, vector<8x8xf32> -> vector<8x8xf32>
    %cst_22 = arith.constant dense<0xFF800000> : vector<8xf32>
    %27 = vector.multi_reduction <maximumf>, %26, %cst_22 [1] : vector<8x8xf32> to vector<8xf32>
    %28 = vector.shape_cast %27 : vector<8xf32> to vector<8x1xf32>
    %29 = vector.broadcast %28 : vector<8x1xf32> to vector<8x8xf32>
    %30 = arith.subf %26, %29 : vector<8x8xf32>
    %31 = math.exp %30 : vector<8x8xf32>
    %cst_23 = arith.constant dense<0.000000e+00> : vector<8xf32>
    %32 = vector.multi_reduction <add>, %31, %cst_23 [1] : vector<8x8xf32> to vector<8xf32>
    %33 = vector.shape_cast %32 : vector<8xf32> to vector<8x1xf32>
    %34 = tpu.reciprocal %33 {approx = true} : vector<8x1xf32> -> vector<8x1xf32>
    %35 = vector.broadcast %34 : vector<8x1xf32> to vector<8x8xf32>
    %36 = arith.mulf %31, %35 : vector<8x8xf32>
    %c0_24 = arith.constant 0 : index
    %c0_25 = arith.constant 0 : index
    %c0_26 = arith.constant 0 : index
    %c0_27 = arith.constant 0 : index
    %37 = vector.load %arg12[%c0_24, %c0_25, %c0_26, %c0_27] : memref<1x1x8x8xf32, #tpu.memory_space<vmem>>, vector<1x1x8x8xf32>
    %38 = vector.shape_cast %37 : vector<1x1x8x8xf32> to vector<8x8xf32>
    %39 = vector.shape_cast %36 : vector<8x8xf32> to vector<1x1x8x8xf32>
    tpu.vector_store %arg12[%c0_24, %c0_25, %c0_26, %c0_27], %39 {strides = array<i32>} : memref<1x1x8x8xf32, #tpu.memory_space<vmem>>, vector<1x1x8x8xf32>,
    %40 = arith.truncf %36 : vector<8x8xf32> to vector<8x8xbf16>
    %cst_28 = arith.constant dense<0.000000e+00> : vector<8x8xf32>
    %41 = tpu.matmul %40, %25, %cst_28 {dimension_numbers = #tpu.dot_dimension_numbers<[1], [0], [0], [1], [0, 0, 1, 1], [], []>} : vector<8x8xbf16>, vector<8x8xbf16>, vector<8x8xf32> -> vector<8x8xf32>
    %c0_29 = arith.constant 0 : index
    %c0_30 = arith.constant 0 : index
    %42 = vector.load %arg13[%c0_29, %c0_30] : memref<8x32xf32, #tpu.memory_space<vmem>>, vector<8x32xf32>
    %43 = arith.truncf %41 : vector<8x8xf32> to vector<8x8xbf16>
    %c0_31 = arith.constant 0 : index
    %c0_32 = arith.constant 0 : index
    %c0_33 = arith.constant 0 : index
    %44 = vector.load %arg8[%c0_31, %c0_32, %c0_33] : memref<1x8x32xbf16, #tpu.memory_space<vmem>>, vector<1x8x32xbf16>
    %45 = vector.shape_cast %44 : vector<1x8x32xbf16> to vector<8x32xbf16>
    %cst_34 = arith.constant dense<0.000000e+00> : vector<8x32xf32>
    %46 = tpu.matmul %43, %45, %cst_34 {dimension_numbers = #tpu.dot_dimension_numbers<[1], [0], [0], [1], [0, 0, 1, 1], [], []>} : vector<8x8xbf16>, vector<8x32xbf16>, vector<8x32xf32> -> vector<8x32xf32>
    %47 = arith.addf %42, %46 : vector<8x32xf32>
    %c0_35 = arith.constant 0 : index
    %c0_36 = arith.constant 0 : index
    %48 = vector.load %arg13[%c0_35, %c0_36] : memref<8x32xf32, #tpu.memory_space<vmem>>, vector<8x32xf32>
    tpu.vector_store %arg13[%c0_35, %c0_36], %47 {strides = array<i32>} : memref<8x32xf32, #tpu.memory_space<vmem>>, vector<8x32xf32>,
    %c3_i32 = arith.constant 3 : i32
    %49 = arith.cmpi eq, %arg1, %c3_i32 : i32
    %50 = arith.extui %49 : i1 to i32
    %c0_i32_37 = arith.constant 0 : i32
    %51 = arith.cmpi ne, %50, %c0_i32_37 : i32
    scf.if %51 {
      %c0_38 = arith.constant 0 : index
      %c0_39 = arith.constant 0 : index
      %52 = vector.load %arg13[%c0_38, %c0_39] : memref<8x32xf32, #tpu.memory_space<vmem>>, vector<8x32xf32>
      %cst_40 = arith.constant dense<0.000000e+00> : vector<8xf32>
      %53 = vector.multi_reduction <add>, %52, %cst_40 [1] : vector<8x32xf32> to vector<8xf32>
      %54 = vector.shape_cast %53 : vector<8xf32> to vector<8x1xf32>
      %cst_41 = arith.constant 3.200000e+01 : f32
      %55 = vector.broadcast %cst_41 : f32 to vector<8x1xf32>
      %56 = arith.divf %54, %55 : vector<8x1xf32>
      %57 = vector.broadcast %56 : vector<8x1xf32> to vector<8x32xf32>
      %58 = arith.subf %52, %57 : vector<8x32xf32>
      %59 = arith.mulf %58, %58 : vector<8x32xf32>
      %cst_42 = arith.constant dense<0.000000e+00> : vector<8xf32>
      %60 = vector.multi_reduction <add>, %59, %cst_42 [1] : vector<8x32xf32> to vector<8xf32>
      %61 = vector.shape_cast %60 : vector<8xf32> to vector<8x1xf32>
      %cst_43 = arith.constant 3.200000e+01 : f32
      %62 = vector.broadcast %cst_43 : f32 to vector<8x1xf32>
      %63 = arith.divf %61, %62 : vector<8x1xf32>
      %64 = vector.broadcast %56 : vector<8x1xf32> to vector<8x32xf32>
      %65 = arith.subf %52, %64 : vector<8x32xf32>
      %cst_44 = arith.constant 9.99999997E-7 : f32
      %66 = vector.broadcast %cst_44 : f32 to vector<8x1xf32>
      %67 = arith.addf %63, %66 : vector<8x1xf32>
      %68 = math.rsqrt %67 : vector<8x1xf32>
      %69 = vector.broadcast %68 : vector<8x1xf32> to vector<8x32xf32>
      %70 = arith.mulf %65, %69 : vector<8x32xf32>
      %c0_45 = arith.constant 0 : index
      %c0_46 = arith.constant 0 : index
      %71 = vector.load %arg9[%c0_45, %c0_46] : memref<1x32xf32, #tpu.memory_space<vmem>>, vector<1x32xf32>
      %72 = vector.broadcast %71 : vector<1x32xf32> to vector<8x32xf32>
      %73 = arith.mulf %70, %72 : vector<8x32xf32>
      %c0_47 = arith.constant 0 : index
      %c0_48 = arith.constant 0 : index
      %74 = vector.load %arg10[%c0_47, %c0_48] : memref<1x32xf32, #tpu.memory_space<vmem>>, vector<1x32xf32>
      %75 = vector.broadcast %74 : vector<1x32xf32> to vector<8x32xf32>
      %76 = arith.addf %73, %75 : vector<8x32xf32>
      %c0_49 = arith.constant 0 : index
      %c0_50 = arith.constant 0 : index
      %c0_51 = arith.constant 0 : index
      %77 = vector.load %arg11[%c0_49, %c0_50, %c0_51] : memref<1x8x32xf32, #tpu.memory_space<vmem>>, vector<1x8x32xf32>
      %78 = vector.shape_cast %77 : vector<1x8x32xf32> to vector<8x32xf32>
      %79 = vector.shape_cast %76 : vector<8x32xf32> to vector<1x8x32xf32>
      tpu.vector_store %arg11[%c0_49, %c0_50, %c0_51], %79 {strides = array<i32>} : memref<1x8x32xf32, #tpu.memory_space<vmem>>, vector<1x8x32xf32>,
    } else {
    }
    return
  }
  func.func @transform_0(%arg0: i32, %arg1: i32) -> (i32, i32, i32) {
    %c0_i32 = arith.constant 0 : i32
    %c0_i32_0 = arith.constant 0 : i32
    %c0_i32_1 = arith.constant 0 : i32
    return %arg0, %c0_i32, %c0_i32_0 : i32, i32, i32
  }
  func.func @transform_1(%arg0: i32, %arg1: i32) -> (i32, i32, i32) {
    %c0_i32 = arith.constant 0 : i32
    %c0_i32_0 = arith.constant 0 : i32
    %c0_i32_1 = arith.constant 0 : i32
    return %arg0, %c0_i32, %c0_i32_0 : i32, i32, i32
  }
  func.func @transform_2(%arg0: i32, %arg1: i32) -> (i32, i32, i32) {
    %c0_i32 = arith.constant 0 : i32
    %c0_i32_0 = arith.constant 0 : i32
    %c0_i32_1 = arith.constant 0 : i32
    return %arg0, %c0_i32, %c0_i32_0 : i32, i32, i32
  }
  func.func @transform_3(%arg0: i32, %arg1: i32) -> (i32, i32, i32) {
    %c0_i32 = arith.constant 0 : i32
    %c0_i32_0 = arith.constant 0 : i32
    %c0_i32_1 = arith.constant 0 : i32
    return %arg1, %c0_i32, %c0_i32_0 : i32, i32, i32
  }
  func.func @transform_4(%arg0: i32, %arg1: i32) -> (i32, i32, i32) {
    %c0_i32 = arith.constant 0 : i32
    %c0_i32_0 = arith.constant 0 : i32
    %c0_i32_1 = arith.constant 0 : i32
    return %arg1, %c0_i32, %c0_i32_0 : i32, i32, i32
  }
  func.func @transform_5(%arg0: i32, %arg1: i32) -> (i32, i32, i32) {
    %c0_i32 = arith.constant 0 : i32
    %c0_i32_0 = arith.constant 0 : i32
    %c0_i32_1 = arith.constant 0 : i32
    return %arg1, %c0_i32, %c0_i32_0 : i32, i32, i32
  }
  func.func @transform_6(%arg0: i32, %arg1: i32) -> (i32, i32, i32) {
    %c0_i32 = arith.constant 0 : i32
    %c0_i32_0 = arith.constant 0 : i32
    %c0_i32_1 = arith.constant 0 : i32
    return %arg1, %c0_i32, %c0_i32_0 : i32, i32, i32
  }
  func.func @transform_7(%arg0: i32, %arg1: i32) -> (i32, i32) {
    %c0_i32 = arith.constant 0 : i32
    %c0_i32_0 = arith.constant 0 : i32
    %c0_i32_1 = arith.constant 0 : i32
    return %c0_i32, %c0_i32_0 : i32, i32
  }
  func.func @transform_8(%arg0: i32, %arg1: i32) -> (i32, i32) {
    %c0_i32 = arith.constant 0 : i32
    %c0_i32_0 = arith.constant 0 : i32
    %c0_i32_1 = arith.constant 0 : i32
    return %c0_i32, %c0_i32_0 : i32, i32
  }
  func.func @transform_9(%arg0: i32, %arg1: i32) -> (i32, i32, i32) {
    %c0_i32 = arith.constant 0 : i32
    %c0_i32_0 = arith.constant 0 : i32
    %c0_i32_1 = arith.constant 0 : i32
    return %arg0, %c0_i32, %c0_i32_0 : i32, i32, i32
  }
  func.func @transform_10(%arg0: i32, %arg1: i32) -> (i32, i32, i32, i32) {
    %c0_i32 = arith.constant 0 : i32
    %c0_i32_0 = arith.constant 0 : i32
    %c0_i32_1 = arith.constant 0 : i32
    return %arg0, %arg1, %c0_i32, %c0_i32_0 : i32, i32, i32, i32
  }
}

</mosaic_0001>

<bundles_post_ra>
// kernel: tpu_custom_call.1
= control target key start
LH: loop header
LB: loop body
LE: loop exit
PB: predicated region body
PF: predicated region fallthrough
CT: control target
= control target key end

     0   :  { %s1787_s0 = inlined_call_operand.vmem [shape: f32[2,8,32], index: 0, kind: input, shape index: {}]   ;;  %s1788_s1 = inlined_call_operand.vmem [shape: f32[2,8,32], index: 1, kind: input, shape index: {}]   ;;  %s1789_s2 = inlined_call_operand.vmem [shape: f32[2,8,32], index: 2, kind: input, shape index: {}]   ;;  %s1790_s3 = inlined_call_operand.vmem [shape: bf16[4,32,8], index: 3, kind: input, shape index: {}]   ;;  %s1791_s4 = inlined_call_operand.vmem [shape: bf16[4,32,8], index: 4, kind: input, shape index: {}]   ;;  %s1792_s5 = inlined_call_operand.vmem [shape: bf16[4,32,8], index: 5, kind: input, shape index: {}]   ;;  %s1793_s6 = inlined_call_operand.vmem [shape: bf16[4,8,32], index: 6, kind: input, shape index: {}]   ;;  %s1794_s7 = inlined_call_operand.vmem [shape: f32[1,32], index: 7, kind: input, shape index: {}]   ;;  %s1795_s8 = inlined_call_operand.vmem [shape: f32[1,32], index: 8, kind: input, shape index: {}]   ;;  %s1796_s9 = inlined_call_operand.hbm [shape: f32[2,8,32], index: 9, kind: output, shape index: {0}]   ;;  %s1797_s10 = inlined_call_operand.hbm [shape: f32[2,4,8,8], index: 10, kind: output, shape index: {1}]  }
   0x1   :  { %1818 = sst [smem:[#allocation24_spill]] %s1787_s0 }
   0x2   :  { %1819 = sst [smem:[#allocation25_spill]] %s1788_s1 }
   0x3   :  { %1820 = sst [smem:[#allocation26_spill]] %s1789_s2 }
   0x4   :  { %1821 = sst [smem:[#allocation27_spill]] %s1796_s9 }
   0x5   :  { %1822 = sst [smem:[#allocation28_spill]] %s1797_s10 }
   0x6   :  { %16 = vsyncpa [#allocation4], 0 }
   0x7   :  { %18 = vsyncpa [#allocation4 + $0x1], 0 }
   0x8   :  { %19 = vsyncpa [#allocation6], 0 }
   0x9   :  { %21 = vsyncpa [#allocation6 + $0x1], 0  ;;  %s1512_s13 = smov 0   ;;  %s1514_s14 = smov 0  }
   0xa   :  { %s1516_s15 = smov 0   ;;  %s1518_s16 = smov 0  }
   0xb   :  { %s1520_s17 = smov 0   ;;  %s1522_s18 = smov 0  }
   0xc   :  { %s1524_s19 = smov 0   ;;  %s1526_s20 = smov 0  }
   0xd   :  { %s1528_s21 = smov 0   ;;  %s1530_s22 = smov 0  }
   0xe   :  { %s1532_s23 = smov 0  }
   0xf LB: > { %1823 = sst [smem:[#allocation9_spill]] %s1411_s13  ;;  %s1091_s24 = sadd.s32 4294967295, %s1451_s23   ;;  %s1451_s23 = sphi %s1532_s23, %s27_s23   ;;  %s1447_s22 = sphi %s1530_s22, %s1868_s22   ;;  %s1443_s21 = sphi %s1528_s21, %s1867_s21   ;;  %s1439_s20 = sphi %s1526_s20, %s1866_s20   ;;  %s1435_s19 = sphi %s1524_s19, %s1865_s19   ;;  %s1431_s18 = sphi %s1522_s18, %s1864_s18   ;;  %s1427_s17 = sphi %s1520_s17, %s1873_s17   ;;  %s1423_s16 = sphi %s1518_s16, %s1872_s16   ;;  %s1419_s15 = sphi %s1516_s15, %s1871_s15   ;;  %s1415_s14 = sphi %s1514_s14, %s1870_s14   ;;  %s1411_s13 = sphi %s1512_s13, %s1869_s13  }
  0x10   : > { %1824 = sst [smem:[#allocation10_spill]] %s1419_s15  ;;  %s1092_s25 = sadd.s32 4294967294, %s1451_s23  }
  0x11   : > { %1825 = sst [smem:[#allocation11_spill]] %s1423_s16  ;;  %s36_s26 = sadd.s32 1, %s1443_s21 }
  0x12   : > { %1826 = sst [smem:[#allocation12_spill]] %s1431_s18  ;;  %s39_s27 = sadd.s32 1, %s1447_s22 }
  0x13   : > { %1827 = sst [smem:[#allocation13_spill]] %s1443_s21  ;;  %p37_p0 = scmp.ge.s32.totalorder %s36_s26, 4 }
  0x14   : > { %1828 = sst [smem:[#allocation14_spill]] %s1447_s22  ;;  %s270_s28 = sadd.s32 1, %s1431_s18 }
  0x15   : > { %1829 = sst [smem:[#allocation15_spill]] %s1451_s23  ;;  %p280_p1 = scmp.ne.s32.totalorder %s1431_s18, %s1427_s17 }
  0x16   : > { %p1574_p2 = scmp.eq.s32.totalorder %s1091_s24, 7  ;;  %s1875_s26 = smov (%p37_p0, %s36_s26), 0 }
  0x17   : > { %1831 = sst [smem:[#allocation16_spill]] %s1875_s26  ;;  %s1877_s27 = smov (!%p37_p0, %s39_s27), %s1447_s22 }
  0x18   : > { %p1583_p3 = por %p1574_p2, %p280_p1  ;;  %p286_p4 = scmp.ne.s32.totalorder %s1427_s17, %s1423_s16 }
  0x19   : > { %p41_p5 = scmp.ge.s32.totalorder %s1877_s27, 2  ;;  %p1589_p6 = scmp.eq.s32.totalorder %s1092_s25, 7 }
  0x1a   : > { %s1832_s30 = scalar_select %p1583_p3, 1, 0 }
  0x1b   : > { %s294_s12 = ssub.s32 %s1443_s21, %s1875_s26  ;;  %s298_s24 = sadd.s32 1, %s1419_s15 }
  0x1c   : > { %1833 = sst [smem:[#allocation17_spill]] %s1832_s30  ;;  %s1879_s27 = smov (%p41_p5, %s1877_s27), 0 }
  0x1d   : > { %1835 = sst [smem:[#allocation18_spill]] %s1879_s27  ;;  %p1600_p7 = por %p1589_p6, %p286_p4 }
  0x1e   : > { %p308_p8 = scmp.ne.s32.totalorder %s1419_s15, %s1415_s14  ;;  %s267_s16 = ssub.s32 %s1447_s22, %s1879_s27 }
  0x1f   : > { %s1836_s10 = scalar_select %p1600_p7, 1, 0 }
  0x20   : > { %p314_p9 = scmp.ne.s32.totalorder %s1415_s14, %s1411_s13  ;;  %p268_p10 = scmp.eq.s32.totalorder %s267_s16, 0 }
  0x21   : > { %1837 = sst [smem:[#allocation19_spill]] %s1836_s10  ;;  %s295_s25 = sor.u32 %s294_s12, %s267_s16 }
  0x22   : > { %p296_p11 = scmp.eq.s32.totalorder %s295_s25, 0  ;;  %p1612_p12 = por %p308_p8, %p1574_p2 }
  0x23   : > { %s1617_s26 = scalar_select %p268_p10, %s1431_s18, %s270_s28  }
  0x24   : > { %s1838_s9 = scalar_select %p1612_p12, 1, 0 }
  0x25   : > { %1840 = sst [smem:[#allocation21_spill]] %s1617_s26  ;;  %p1624_p13 = por %p314_p9, %p1589_p6 }
  0x26   : > { %1839 = sst [smem:[#allocation20_spill]] %s1838_s9  ;;  %p1095_p0 = scmp.ge.s32.totalorder %s1451_s23, 1 }
  0x27   : > { %s1620_s21 = scalar_select %p296_p11, %s1419_s15, %s298_s24  }
  0x28   : > { %s1842_s30 = scalar_select %p1624_p13, 1, 0 }
  0x29   : > { %1841 = sst [smem:[#allocation22_spill]] %s1620_s21  ;;  %p391_p1 = scmp.lt.s32.totalorder %s1451_s23, 9 }
  0x2a   : > { %1843 = sst [smem:[#allocation23_spill]] %s1842_s30 }
  0x2b   : > { %p392_p4 = pnand %p1095_p0, %p391_p1 }
  0x2c   : > { %s1809_s16 = sand.u32 (!%p392_p4), 1, %s1427_s17   ;;  %s1811_s28 = sand.u32 (!%p392_p4), 1, %s1415_s14  }
  0x2d   : > { %395 = sbr.rel (%p392_p4) target bundleno = 1542 (0x606), region = 56  ;;  %s1634_s29 = sshll.u32 (!%p392_p4), %s1809_s16, 3 }
  0x2e   : > { %s1638_s11 = sshll.u32 (!%p392_p4), %s1811_s28, 3  ;;  %p460_p2 = scmp.lt.s32.totalorder (!%p392_p4), %s1439_s20, 1 }
  0x2f   : > { %p472_p5 = scmp.lt.s32.totalorder (!%p392_p4), %s1435_s19, 3  ;;  %s1844_s0 = sld [smem:[#allocation24_spill]] (!%p392_p4) }
  0x30   : > { %s1845_s1 = sld [smem:[#allocation25_spill]] (!%p392_p4)  ;;  %s452_s10 = scalar_lea.vmem (!%p392_p4), [#allocation3], %s1634_s29 }
  0x31   : > { %s1846_s2 = sld [smem:[#allocation26_spill]] (!%p392_p4)  ;;  %s459_s23 = scalar_lea.vmem (!%p392_p4), [#allocation5], %s1638_s11 }
  0x32   : > { %s461_s12 = scalar_select %p460_p2, %s1439_s20, 1 }
  0x33   : > { %s473_s24 = scalar_select %p472_p5, %s1435_s19, 3 }
  0x34   : > { %s1098_s25 = sshll.u32 %s461_s12, 3  ;;  %p1108_p6 = scmp.ne.s32.totalorder %s1435_s19, 0 }
  0x35   : > { %s463_s26 = scalar_lea.vmem %s1844_s0, %s1098_s25  ;;  %s1131_s13 = sshll.u32 %s473_s24, 4 }
  0x36   : > { %s467_s15 = scalar_lea.vmem %s1845_s1, %s1098_s25  ;;  %v492_v0 = vld [vmem:[%s463_s26] sm:$0xff]  ;;  %s476_s12 = scalar_lea.vmem %s1790_s3, %s1131_s13 }
  0x37   : > { %s471_s28 = scalar_lea.vmem %s1846_s2, %s1098_s25  ;;  %v494_v1 = vld [vmem:[%s467_s15] sm:$0xff]  ;;  %s481_s27 = scalar_lea.vmem %s1791_s4, %s1131_s13  ;;  %v493_v2 = vpack.c.bf16 %v492_v0, %v492_v0 }
  0x38   : > { %v495_v3 = vpack.c.bf16 %v494_v1, %v494_v1  ;;  %v496_v4 = vld [vmem:[%s471_s28] sm:$0xff]  ;;  %s1662_s0 = scalar_lea.vmem %s1792_s5, %s1131_s13  ;;  %s1107_s30 = sshll.u32 %s473_s24, 2 }
  0x39   : > { %v497_v5 = vpack.c.bf16 %v496_v4, %v496_v4  ;;  %s1667_s25 = scalar_lea.vmem %s1793_s6, %s1107_s30  ;;  %501 = sbr.rel (%p1108_p6) target bundleno = 64 (0x40), region = 60 }
  0x3e   : > { %v502_v6 = vld [vmem:[%s463_s26] sm:$0xff]  ;;  %vm503_vm0 = vcmask 261120  }
  0x3f   : > { %504 = vst.msk [vmem:[#allocation2] sm:$0xff] %vm503_vm0, %v502_v6 }
  0x40 PF: > { %v1293_v7 = vld [vmem:[%s481_s27 + $0x8] sm:$0xff]   ;;  %v1453_v8 = vmov 0.0   ;;  %v1295_v10 = vld [vmem:[%s481_s27] sm:$0xff]   ;;  %vm1454_vm1 = vmmov 0   ;;  %vm521_vm2 = vcmask 261120   ;;  %vm687_vm3 = vcmask 64512  }
  0x41   : > { %1157 = vmatprep.subr.bf16.mxu1 %v1453_v8  ;;  %1149 = vmatprep.subr.bf16.mxu0 %v1453_v8  ;;  %v1294_v9 = vld [vmem:[%s476_s12 + $0x8] sm:$0xff]   ;;  %v1296_v11 = vld [vmem:[%s476_s12] sm:$0xff]   ;;  %vm750_vm4 = vcmask 1043456   ;;  %p1121_p8 = scmp.ne.s32.totalorder %s1435_s19, 3 }
  0x42   : > { %1158 = vmatpush3.bf16.msra.mxu1 %v1293_v7  ;;  %1161 = vmatprep.mubr.msk.bf16.mxu1 %vm1454_vm1, %v1453_v8  ;;  %v1297_v24 = vld [vmem:[%s1662_s0 + $0x8] sm:$0xff]   ;;  %v1298_v25 = vld [vmem:[%s1662_s0] sm:$0xff]  }
  0x43   : > { %1150 = vmatpush3.bf16.msra.mxu0 %v1294_v9  ;;  %1159 = vmatprep.subr.bf16.mxu1 %v1453_v8  ;;  %v796_v42 = vld [vmem:[%s1667_s25] sm:$0xf] }
  0x44   : > { %1151 = vmatprep.subr.bf16.mxu0 %v1453_v8  ;;  %1153 = vmatprep.mubr.msk.bf16.mxu0 %vm1454_vm1, %v1453_v8  ;;  %v801_v43 = vsel %vm750_vm4, %v796_v42, 0 }
  0x46   : > { %1160 = vmatpush3.bf16.msra.mxu1 %v1295_v10  ;;  %v794_v53 = vld [vmem:[#allocation2] sm:$0xff] }
  0x47   : > { %1152 = vmatpush3.bf16.msra.mxu0 %v1296_v11  ;;  %1173 = vmatprep.subr.bf16.mxu1 %v1453_v8 }
  0x48   : > { %1165 = vmatprep.subr.bf16.mxu0 %v1453_v8 }
  0x49   : > { %1162 = vmatmul.mubr.msk.bf16.vlgmr.msra.gmra.mxu1 %vm521_vm2, %v495_v3 }
  0x4a   : > { %1154 = vmatmul.mubr.msk.bf16.vlgmr.msra.gmra.mxu0 %vm521_vm2, %v493_v2  ;;  %1175 = vmatprep.mubr.msk.bf16.mxu1 %vm1454_vm1, %v1453_v8 }
  0x4b   : > { %1169 = vmatprep.mubr.msk.bf16.mxu0 %vm1454_vm1, %v1453_v8  ;;  %1166 = vmatpush3.bf16.msra.mxu0 %v1297_v24 }
  0x4c   : > { %1167 = vmatprep.subr.bf16.mxu0 %v1453_v8 }
  0x4f   : > { %1168 = vmatpush3.bf16.msra.mxu0 %v1298_v25 }
  0x50   : > { %1179 = vmatprep.subr.bf16.mxu0 %v1453_v8 }
  0x52   : > { %1170 = vmatmul.mubr.msk.bf16.vlgmr.msra.gmra.mxu0 %vm521_vm2, %v497_v5 }
  0x53   : > { %1181 = vmatprep.mubr.msk.bf16.mxu0 %vm1454_vm1, %v1453_v8 }
 0x109   : > { %v618_v12 = vpop.f32.mrf.mxu1 }
 0x10a   : > { %v685_v13 = vpack.c.bf16 %v618_v12, %v618_v12  ;;  %v559_v14 = vpop.f32.mrf.mxu0 }
 0x10b   : > { %v1163_v15 = vpop.f32.mrf.mxu1  ;;  %v683_v17 = vmul.f32 0.35355338, %v559_v14 }
 0x10c   : > { %v692_v16 = vsel %vm687_vm3, %v685_v13, 0  ;;  %v1155_v18 = vpop.f32.mrf.mxu0 }
 0x10d   : > { %v621_v19 = vpop.f32.mrf.mxu1  ;;  %1174 = vmatpush3.bf16.xpose.msra.mxu1 %v692_v16  ;;  %v684_v22 = vpack.c.bf16 %v683_v17, %v683_v17 }
 0x10e   : > { %v562_v20 = vpop.f32.mrf.mxu0  ;;  %1185 = vmatprep.subr.bf16.mxu1 %v1453_v8 }
 0x10f   : > { %v1164_v21 = vpop.f32.mrf.mxu1 }
 0x110   : > { %v1156_v23 = vpop.f32.mrf.mxu0 }
 0x112   : > { %v677_v36 = vpop.f32.mrf.mxu0 }
 0x113   : > { %v686_v40 = vpack.c.bf16 %v677_v36, %v677_v36 }
 0x114   : > { %1176 = vmatmul.mubr.msk.bf16.vlgmr.msra.gmra.mxu1 %vm687_vm3, %v684_v22  ;;  %v1171_v37 = vpop.f32.mrf.mxu0 }
 0x115   : > { %1187 = vmatprep.mubr.msk.bf16.mxu1 %vm1454_vm1, %v1453_v8  ;;  %v752_v41 = vsel %vm750_vm4, %v686_v40, 0  ;;  %1186 = vmatpush3.bf16.msra.mxu1 %v801_v43 }
 0x116   : > { %v680_v38 = vpop.f32.mrf.mxu0  ;;  %1180 = vmatpush3.bf16.msra.mxu0 %v752_v41 }
 0x118   : > { %v1172_v39 = vpop.f32.mrf.mxu0 }
 0x1d4   : > { %v728_v26 = vpop.f32.mrf.mxu1 }
 0x1d5   : > { %v734_v27 = vsel %vm687_vm3, %v728_v26, -inf }
 0x1d6   : > { %735 = vmax.xlane.f32.xlu0 %v734_v27  ;;  %v1177_v28 = vpop.f32.mrf.mxu1 }
 0x1d8   : > { %v731_v29 = vpop.f32.mrf.mxu1 }
 0x1da   : > { %v1178_v30 = vpop.f32.mrf.mxu1 }
 0x25f   : > { %v736_v31 = vpop.xlane.xlu0 %735 }
 0x260   : > { %v737_v32 = vsub.f32 %v728_v26, %v736_v31 }
 0x262   : > { %v738_v33 = vmul.f32 1.442695, %v737_v32 }
 0x264   : > { %1299 = vpow2.f32 %v738_v33 }
 0x271   : > { %v1300_v34 = vpop.eup %1299 }
 0x272   : > { %v740_v35 = vsel %vm687_vm3, %v1300_v34, 0.0 }
 0x273   : > { %741 = vadd.xlane.f32.xlu0 %v740_v35 }
 0x2fc   : > { %v742_v44 = vpop.xlane.xlu0 %741 }
 0x2fd   : > { %1301 = vrcp.f32 %v742_v44 }
 0x30a   : > { %v1302_v45 = vpop.eup %1301 }
 0x30b   : > { %v744_v46 = vmul.f32 %v1302_v45, %v1300_v34 }
 0x30d   : > { %745 = vst.msk [vmem:[%s459_s23] sm:$0xff] %vm687_vm3, %v744_v46  ;;  %v746_v47 = vpack.c.bf16 %v744_v46, %v744_v46 }
 0x30f   : > { %1182 = vmatmul.mubr.msk.bf16.vlgmr.msra.gmra.mxu0 %vm687_vm3, %v746_v47 }
 0x3cf   : > { %v788_v48 = vpop.f32.mrf.mxu0 }
 0x3d0   : > { %v795_v49 = vpack.c.bf16 %v788_v48, %v788_v48 }
 0x3d1   : > { %v1183_v50 = vpop.f32.mrf.mxu0 }
 0x3d2   : > { %1188 = vmatmul.mubr.msk.bf16.vlgmr.msra.gmra.mxu1 %vm687_vm3, %v795_v49 }
 0x3d3   : > { %v791_v51 = vpop.f32.mrf.mxu0 }
 0x3d5   : > { %v1184_v52 = vpop.f32.mrf.mxu0 }
 0x492   : > { %v837_v54 = vpop.f32.mrf.mxu1 }
 0x493   : > { %v843_v55 = vadd.f32 %v837_v54, %v794_v53 }
 0x494   : > { %v1189_v56 = vpop.f32.mrf.mxu1  ;;  %848 = sbr.rel (%p1121_p8) target bundleno = 1490 (0x5d2), region = 64 }
 0x495   : > { %844 = vst.msk [vmem:[#allocation2] sm:$0xff] %vm521_vm2, %v843_v55 }
 0x496   : > { %v840_v57 = vpop.f32.mrf.mxu1 }
 0x498   : > { %v1190_v58 = vpop.f32.mrf.mxu1 }
 0x499   : > { %v1122_v6 = vld [vmem:[%s1794_s7] ss:$0 sm:$0xff] }
 0x49a   : > { %v1123_v8 = vld [vmem:[%s1795_s8] ss:$0 sm:$0xff] }
 0x49c   : > { %v849_v59 = vld [vmem:[#allocation2] sm:$0xff] }
 0x49d   : > { %v850_v60 = vsel %vm521_vm2, %v849_v59, 0.0 }
 0x49e   : > { %851 = vadd.xlane.f32.xlu0 %v850_v60 }
 0x527   : > { %v852_v61 = vpop.xlane.xlu0 %851 }
 0x528   : > { %v854_v62 = vmul.f32 0.03125, %v852_v61 }
 0x52a   : > { %v855_v63 = vsub.f32 %v849_v59, %v854_v62 }
 0x52c   : > { %v856_v0 = vmul.f32 %v855_v63, %v855_v63 }
 0x52e   : > { %v857_v1 = vsel %vm521_vm2, %v856_v0, 0.0 }
 0x52f   : > { %858 = vadd.xlane.f32.xlu0 %v857_v1 }
 0x5b8   : > { %v859_v2 = vpop.xlane.xlu0 %858 }
 0x5b9   : > { %v860_v3 = vmul.f32 0.03125, %v859_v2 }
 0x5bb   : > { %v861_v4 = vadd.f32 1e-06, %v860_v3 }
 0x5bd   : > { %1303 = vrsqrt.f32 %v861_v4 }
 0x5ca   : > { %v1304_v5 = vpop.eup %1303 }
 0x5cb   : > { %v863_v7 = vmul.f32 %v1304_v5, %v855_v63 }
 0x5cd   : > { %v871_v9 = vmul.f32 %v1122_v6, %v863_v7 }
 0x5cf   : > { %v879_v10 = vadd.f32 %v1123_v8, %v871_v9 }
 0x5d1   : > { %880 = vst.msk [vmem:[%s452_s10] sm:$0xff] %vm521_vm2, %v879_v10 }
 0x5d2 PF: > { %s1126_s24 = sshll.u32 %s1439_s20, 7  ;;  %s1848_s27 = sld [smem:[#allocation27_spill]] }
 0x5d3   : > { %s900_s21 = sshll.u32 %s452_s10, 4  ;;  %s1849_s30 = sand.u32 1, %s1427_s17   ;;  %s901_s21 = int_to_ptr.vmem [resolvable:$true] %s900_s21 }
 0x5d4   : > { %s882_s16 = scalar_lea.sflag [#allocation4], %s1849_s30  ;;  %s1305_s15 = scalar_lea.vmem %s901_s21, 128 }
 0x5d5   : > { %p1306_p9 = scmp.ne.s32.totalorder %s901_s21, %s1305_s15  ;;  %s1455_s25 = smov [#allocation3]  }
 0x5d6   : > { %s1309_s0 = sshll.u32 %s1455_s25, 4  ;;  %s1310_s0 = int_to_ptr.vmem [resolvable:$false] %s1309_s0 }
 0x5d7   : > { %p1307_p10 = pnand %p1306_p9, %p1583_p3  ;;  %s1311_s9 = scalar_lea.vmem %s1310_s0, 256 }
 0x5d8   : > { %s898_s18 = scalar_lea.hbm %s1848_s27, %s1126_s24  ;;  %p1312_p0 = scmp.lt.s32.totalorder %s901_s21, %s1310_s0 }
 0x5d9   : > { %p1308_p11 = pneg %p1307_p10  ;;  %p1313_p1 = scmp.lt.s32.totalorder %s1311_s9, %s1305_s15 }
 0x5db   : > { %p1314_p4 = por %p1313_p1, %p1312_p0 }
 0x5dd   : > { %p1315_p2 = pnand %p1314_p4, %p1308_p11 }
 0x5df   : > { %1318 = shalt.err (!%p1315_p2)
}
 0x5e0   : > { %s1319_s13 = scalar_lea.hbm %s898_s18, 128  ;;  %s1323_s26 = scalar_lea.hbm %s1848_s27, 256 }
 0x5e1   : > { %p1320_p5 = scmp.ne.s32.totalorder %s898_s18, %s1319_s13  ;;  %p1324_p9 = scmp.lt.s32.totalorder %s898_s18, %s1848_s27 }
 0x5e2   : > { %p1325_p10 = scmp.lt.s32.totalorder %s1323_s26, %s1319_s13 }
 0x5e3   : > { %p1321_p6 = pnand %p1320_p5, %p1583_p3 }
 0x5e4   : > { %p1326_p13 = por %p1325_p10, %p1324_p9 }
 0x5e5   : > { %p1322_p8 = pneg %p1321_p6 }
 0x5e7   : > { %p1327_p7 = pnand %p1326_p13, %p1322_p8 }
 0x5e9   : > { %1330 = shalt.err (!%p1327_p7)
}
 0x5ea   : > { %1191 = dma.vmem_to_hbm [thread:$0]  (%p1583_p3), %s901_s21, 128, %s898_s18, %s882_s16  }
 0x5eb   : > { %s1127_s30 = sshll.u32 %s1439_s20, 2  ;;  %s915_s15 = sshll.u32 %s459_s23, 4  ;;  %s916_s15 = int_to_ptr.vmem [resolvable:$true] %s915_s15 }
 0x5ec   : > { %s911_s25 = sadd.s32 %s1435_s19, %s1127_s30  ;;  %s1851_s13 = sld [smem:[#allocation28_spill]] }
 0x5ed   : > { %s1128_s0 = sshll.u32 %s911_s25, 7  ;;  %s1853_s24 = sand.u32 1, %s1415_s14  }
 0x5ee   : > { %s887_s12 = scalar_lea.sflag [#allocation6], %s1853_s24  ;;  %s1331_s1 = scalar_lea.vmem %s916_s15, 128 }
 0x5ef   : > { %p1332_p7 = scmp.ne.s32.totalorder %s916_s15, %s1331_s1  ;;  %s1456_s28 = smov [#allocation5]  }
 0x5f0   : > { %s1335_s2 = sshll.u32 %s1456_s28, 4  ;;  %s1336_s2 = int_to_ptr.vmem [resolvable:$false] %s1335_s2 }
 0x5f1   : > { %p1333_p13 = pnand %p1332_p7, %p1612_p12  ;;  %s1337_s20 = scalar_lea.vmem %s1336_s2, 256 }
 0x5f2   : > { %s1852_s10 = smov %s1851_s13  ;;  %s913_s26 = scalar_lea.hbm %s1851_s13, %s1128_s0 }
 0x5f3   : > { %p1334_p11 = pneg %p1333_p13  ;;  %p1338_p3 = scmp.lt.s32.totalorder %s916_s15, %s1336_s2 }
 0x5f4   : > { %p1339_p0 = scmp.lt.s32.totalorder %s1337_s20, %s1331_s1 }
 0x5f6   : > { %p1340_p1 = por %p1339_p0, %p1338_p3 }
 0x5f8   : > { %p1341_p4 = pnand %p1340_p1, %p1334_p11 }
 0x5fa   : > { %1344 = shalt.err (!%p1341_p4)
}
 0x5fb   : > { %s1345_s19 = scalar_lea.hbm %s913_s26, 128  ;;  %s1349_s18 = scalar_lea.hbm %s1852_s10, 1024 }
 0x5fc   : > { %p1346_p2 = scmp.ne.s32.totalorder %s913_s26, %s1345_s19  ;;  %p1350_p8 = scmp.lt.s32.totalorder %s913_s26, %s1852_s10 }
 0x5fd   : > { %p1351_p9 = scmp.lt.s32.totalorder %s1349_s18, %s1345_s19 }
 0x5fe   : > { %p1347_p5 = pnand %p1346_p2, %p1612_p12 }
 0x5ff   : > { %p1352_p10 = por %p1351_p9, %p1350_p8 }
 0x600   : > { %p1348_p6 = pneg %p1347_p5 }
 0x602   : > { %p1353_p7 = pnand %p1352_p10, %p1348_p6 }
 0x604   : > { %1356 = shalt.err (!%p1353_p7)
}
 0x605   : > { %1192 = dma.vmem_to_hbm [thread:$0]  (%p1612_p12), %s916_s15, 128, %s913_s26, %s887_s12  }
 0x606 PF: > { %s1854_s1 = sld [smem:[#allocation15_spill]] }
 0x607   : > { %s1855_s2 = sld [smem:[#allocation11_spill]] }
 0x608   : > { %s1856_s30 = sld [smem:[#allocation19_spill]] }
 0x60c   : > { %p1202_p13 = scmp.ge.s32.totalorder %s1854_s1, 2 }
 0x60d   : > { %s927_s25 = sand.u32 1, %s1855_s2  }
 0x60e   : > { %p1857_p11 = scmp.ne.s32.totalorder %s1856_s30, 0  ;;  %s928_s0 = scalar_lea.sflag [#allocation4], %s927_s25 }
 0x610   : > { %p1196_p3 = pnand %p1202_p13, %p1857_p11 }
 0x612   : > { %p1197_p0 = pneg %p1196_p3 }
 0x614   : > { %1402 = dma.done.wait (%p1197_p0), %s928_s0, 128  }
 0x615   : > { %1404 = vsyncadd (%p1197_p0), %s928_s0, 4294967168  ;;  %s1858_s9 = sld [smem:[#allocation9_spill]] }
 0x616   : > { %s1859_s29 = sld [smem:[#allocation23_spill]] }
 0x61b   : > { %s936_s13 = sand.u32 1, %s1858_s9  }
 0x61c   : > { %p1860_p1 = scmp.ne.s32.totalorder %s1859_s29, 0  ;;  %s937_s22 = scalar_lea.sflag [#allocation6], %s936_s13 }
 0x61e   : > { %p1199_p4 = pnand %p1202_p13, %p1860_p1 }
 0x620   : > { %p1200_p2 = pneg %p1199_p4 }
 0x622   : > { %1406 = dma.done.wait (%p1200_p2), %s937_s22, 128  }
 0x623   : > { %1408 = vsyncadd (%p1200_p2), %s937_s22, 4294967168  ;;  %s27_s23 = sadd.s32 1, %s1854_s1   ;;  %s1861_s15 = sld [smem:[#allocation10_spill]] }
 0x624   : > { %p24_p12 = scmp.ge.s32.totalorder %s27_s23, 10   ;;  %s1862_s26 = sld [smem:[#allocation22_spill]] }
 0x625   : > { %s1863_s24 = sld [smem:[#allocation12_spill]]  ;;  %s1869_s13 = smov %s1415_s14 }
 0x626   : > { %s1864_s18 = sld [smem:[#allocation21_spill]]  ;;  %s1872_s16 = smov %s1427_s17 }
 0x627   : > { %s1865_s19 = sld [smem:[#allocation13_spill]]  ;;  %26 = sbr.rel (!%p24_p12) target bundleno = 15 (0xf), region = 134 }
 0x628   : > { %s1866_s20 = sld [smem:[#allocation14_spill]] }
 0x629   : > { %s1867_s21 = sld [smem:[#allocation16_spill]]  ;;  %s1870_s14 = smov %s1861_s15 }
 0x62a   : > { %s1868_s22 = sld [smem:[#allocation18_spill]]  ;;  %s1871_s15 = smov %s1862_s26 }
 0x62b   : > { %s1873_s17 = smov %s1863_s24 }
 0x62c   :  { %942 = vsyncpa [#allocation4], 1 }
 0x62d   :  { %944 = vsyncpa [#allocation4 + $0x1], 1 }
 0x62e   :  { %945 = vsyncpa [#allocation6], 1 }
 0x62f   :  { %947 = vsyncpa [#allocation6 + $0x1], 1 }

</bundles_post_ra>
